<compile_context>
chip_gen: v7x
topology: tpu7x:2x2x1
jax: 0.10.0
libtpu: 0.0.40
codegen_flags: <defaults>
</compile_context>

<pallas_src>
import jax
import jax.numpy as jnp
from jax import lax
from jax.experimental import pallas as pl
from jax.experimental.pallas import tpu as pltpu


# --------------------------------- kernel -----------------------------------

def iblock_kernel(x_ref, vc_ref, vm_ref, w0_ref, w1_ref, w2_ref, o_ref):
    Nb, H, WC = x_ref.shape
    M = Nb * H
    WCm = vm_ref.shape[1]
    mm_dtype = w0_ref.dtype                     # f32 or bf16 matmul path

    x = x_ref[...].reshape(M, WC)               # lane-dense (rows = n*H+h, lanes = w*C+c)

    # bn0 (folded scale/bias, pre-tiled across W)
    t = x * vc_ref[0, :] + vc_ref[1, :]

    # conv0: 1x1 C->Cm, block-diagonal lane-dense matmul
    t = jnp.dot(t.astype(mm_dtype), w0_ref[...],
                preferred_element_type=jnp.float32)                     # (M, W*Cm)

    # bn1 (folded)
    t = t * vm_ref[0, :] + vm_ref[1, :]

    # conv1: 3x3, pad=1, stride=1.
    #   Row taps h-1 / h+1 via XLU sublane rolls + per-row edge masks (the mask
    #   also zeroes the wrap between adjacent images in the block); column taps
    #   + zero padding are encoded in the three banded weight blocks, consumed
    #   by three accumulating matmuls (no concatenate, no shift matmuls).
    h = lax.broadcasted_iota(jnp.int32, (M, WCm), 0) % H
    up = jnp.where(h != 0, pltpu.roll(t, shift=1, axis=0), 0.0)         # source row h-1
    dn = jnp.where(h != H - 1, pltpu.roll(t, shift=M - 1, axis=0), 0.0)  # source row h+1
    t = (jnp.dot(up.astype(mm_dtype), w1_ref[0], preferred_element_type=jnp.float32)
         + jnp.dot(t.astype(mm_dtype), w1_ref[1], preferred_element_type=jnp.float32)
         + jnp.dot(dn.astype(mm_dtype), w1_ref[2], preferred_element_type=jnp.float32))

    # bn2 (folded)
    t = t * vm_ref[2, :] + vm_ref[3, :]

    # PReLU (per-channel alpha, pre-tiled across W) -- stays f32 (v5e: no bf16 VPU)
    t = jnp.where(t > 0, t, vm_ref[4, :] * t)

    # conv2: 1x1 Cm->C, block-diagonal lane-dense matmul
    t = jnp.dot(t.astype(mm_dtype), w2_ref[...],
                preferred_element_type=jnp.float32)                     # (M, W*C)

    # bn3 (folded) + identity residual (re-loaded here so x isn't live across
    # the matmuls -> fewer vreg spills at large blocks)
    t = t * vc_ref[2, :] + vc_ref[3, :] + x_ref[...].reshape(M, WC)

    o_ref[...] = t.reshape(Nb, H, WC).astype(o_ref.dtype)


# -------------------------------- wrapper ------------------------------------

def ibasic_block_pallas(x, params, *, block_n=None, matmul_dtype=jnp.float32):
    """x: (N, H, W, C) float32, NHWC layout. Returns (N, H, W, C)."""
    N, H, W, C = x.shape
    (s0, b0, w0, s1, b1, w1, s2, b2, alpha, w2, s3, b3) = params
    Cm = w0.shape[1]

    if block_n is None:
        # >=2 grid steps: v7x dual-TensorCore sharding of the "parallel" batch
        # axis + DMA/compute overlap from BlockSpec double-buffering.
        block_n = N
        for cand in range(N // 2, 0, -1):
            if N % cand == 0:
                block_n = cand
                break
    assert N % block_n == 0, (N, block_n)
    assert H % 8 == 0, "row axis must be sublane aligned"
    # NOTE: W*C (and ideally W*Cm) should be a multiple of 128 for full-lane
    # vld/vst; smaller widths still work but fall back to masked accesses.

    WC, WCm = W * C, W * Cm
    M = block_n * H
    f32 = jnp.float32
    mm = matmul_dtype

    # lane-dense activation view (rows = (n, h), lanes = w*C + c)
    x2 = x.reshape(N, H, WC)

    # folded BN / PReLU per-channel vectors, tiled across W for lane-dense use
    tile = lambda v: jnp.tile(v.reshape(-1), W)
    vec_c = jnp.stack([tile(s0), tile(b0), tile(s3), tile(b3)])               # (4, W*C)
    vec_m = jnp.stack([tile(s1), tile(b1), tile(s2), tile(b2), tile(alpha)])  # (5, W*Cm)

    # conv weights expanded to lane-dense matmul form (bf16 path halves their
    # VMEM/DMA bytes; accumulation stays f32 in the kernel).
    eye_w = jnp.eye(W, dtype=f32)
    w0b = jnp.kron(eye_w, w0).astype(mm)                                      # (W*C , W*Cm)
    w2b = jnp.kron(eye_w, w2).astype(mm)                                      # (W*Cm, W*C)
    # banded 3x3 column taps (incl. zero padding); one block per row tap dh
    w1b = jnp.stack(
        [sum(jnp.kron(jnp.eye(W, k=1 - dw, dtype=f32), w1[dh, dw])
             for dw in range(3))
         for dh in range(3)]).astype(mm)                                      # (3, W*Cm, W*Cm)

    grid = (N // block_n,)

    def rep_spec(arr):
        zeros = (0,) * arr.ndim
        return pl.BlockSpec(arr.shape, lambda i, _z=zeros: _z)

    in_specs = [pl.BlockSpec((block_n, H, WC), lambda i: (i, 0, 0))]
    in_specs += [rep_spec(a) for a in (vec_c, vec_m, w0b, w1b, w2b)]
    out_spec = pl.BlockSpec((block_n, H, WC), lambda i: (i, 0, 0))

    # honest cost estimate (no shift matmuls, no shift operand)
    steps = N // block_n
    itemsize = jnp.dtype(mm).itemsize
    flops = 2 * steps * M * (WC * WCm            # conv0
                             + 3 * WCm * WCm     # conv1 (3 row-tap matmuls)
                             + WCm * WC)         # conv2
    bytes_accessed = (4 * 2 * N * H * WC
                      + 4 * (int(vec_c.size) + int(vec_m.size))
                      + itemsize * (int(w0b.size) + int(w1b.size) + int(w2b.size)))
    cost = pl.CostEstimate(flops=int(flops), transcendentals=0,
                           bytes_accessed=int(bytes_accessed))

    # explicit VMEM budget: double-buffered x/out blocks + resident weights +
    # f32 intermediates, with headroom; capped so it also fits v7x (64 MiB).
    act_block = 4 * block_n * H * WC
    interm = 4 * block_n * H * (2 * WC + 5 * WCm)
    weight_bytes = itemsize * (int(w0b.size) + int(w1b.size) + int(w2b.size))
    vec_bytes = 4 * (int(vec_c.size) + int(vec_m.size))
    need = 4 * act_block + 2 * (weight_bytes + vec_bytes) + interm
    vmem_limit = int(min(max(2 * need, 32 << 20), 56 << 20))

    out2 = pl.pallas_call(
        iblock_kernel,
        out_shape=jax.ShapeDtypeStruct((N, H, WC), x.dtype),
        grid_spec=pltpu.PrefetchScalarGridSpec(
            num_scalar_prefetch=0,
            grid=grid,
            in_specs=in_specs,
            out_specs=out_spec,
        ),
        compiler_params=pltpu.CompilerParams(
            dimension_semantics=("parallel",),
            vmem_limit_bytes=vmem_limit),
        cost_estimate=cost,
    )(x2, vec_c, vec_m, w0b, w1b, w2b)

    return out2.reshape(N, H, W, C)


# ----------------------------- parameter setup -------------------------------

def make_params(key, planes):
    """Deterministic synthetic parameters matching IBasicBlock.__init__ shapes."""
    C = planes
    Cm = int(planes * 0.25)
    eps = 2e-05
    ks = jax.random.split(key, 20)
    ki = iter(ks)

    def bn_params(k1, k2, k3, k4, ch):
        gamma = 1.0 + 0.1 * jax.random.normal(k1, (ch,), jnp.float32)
        beta = 0.1 * jax.random.normal(k2, (ch,), jnp.float32)
        mean = 0.1 * jax.random.normal(k3, (ch,), jnp.float32)
        var = 0.5 + jnp.abs(jax.random.normal(k4, (ch,), jnp.float32))
        scale = gamma / jnp.sqrt(var + eps)
        bias = beta - mean * scale
        return scale.reshape(1, ch), bias.reshape(1, ch)

    s0, b0 = bn_params(next(ki), next(ki), next(ki), next(ki), C)
    # conv0: PyTorch weight (Cm, C, 1, 1) -> matmul form (C, Cm)
    w0 = 0.2 * jax.random.normal(next(ki), (C, Cm), jnp.float32)
    s1, b1 = bn_params(next(ki), next(ki), next(ki), next(ki), Cm)
    # conv1: PyTorch weight (Cm, Cm, 3, 3) -> HWIO (3, 3, Cm, Cm)
    w1 = 0.2 * jax.random.normal(next(ki), (3, 3, Cm, Cm), jnp.float32)
    s2, b2 = bn_params(next(ki), next(ki), next(ki), next(ki), Cm)
    alpha = (0.25 + 0.05 * jax.random.normal(next(ki), (Cm,), jnp.float32)
             ).reshape(1, Cm)
    # conv2: PyTorch weight (C, Cm, 1, 1) -> matmul form (Cm, C)
    w2 = 0.2 * jax.random.normal(next(ki), (Cm, C), jnp.float32)
    s3, b3 = bn_params(next(ki), next(ki), next(ki), next(ki), C)

    return (s0, b0, w0, s1, b1, w1, s2, b2, alpha, w2, s3, b3)


# ------------------------------- JAX reference --------------------------------

def ibasic_block_ref(x, params):
    (s0, b0, w0, s1, b1, w1, s2, b2, alpha, w2, s3, b3) = params
    t = x * s0[0] + b0[0]
    t = jnp.einsum('nhwc,cm->nhwm', t, w0)
    t = t * s1[0] + b1[0]
    t = lax.conv_general_dilated(
        t, w1, window_strides=(1, 1), padding=((1, 1), (1, 1)),
        dimension_numbers=('NHWC', 'HWIO', 'NHWC'))
    t = t * s2[0] + b2[0]
    t = jnp.where(t > 0, t, alpha[0] * t)
    t = jnp.einsum('nhwm,mc->nhwc', t, w2)
    t = t * s3[0] + b3[0]
    return t + x


# ----------------------------------- main -------------------------------------

if __name__ == "__main__":
    key = jax.random.PRNGKey(0)
    kx, kp = jax.random.split(key)

    N, H, W = 2, 16, 16
    planes = 16                      # C = 16, C_mid = int(16 * 0.25) = 4
    x = jax.random.normal(kx, (N, H, W, planes), jnp.float32)   # NHWC
    params = make_params(kp, planes)

    ref = ibasic_block_ref(x, params)

    # f32 matmul path: strict check against the f32 reference.
    out = jax.block_until_ready(ibasic_block_pallas(x, params))
    assert out.shape == ref.shape == (N, H, W, planes)
    err = float(jnp.max(jnp.abs(out - ref)))
    assert jnp.allclose(out, ref, atol=2e-4, rtol=2e-4), err

    # bf16 matmul path (f32 accumulate, f32 elementwise): looser tolerance.
    out_bf16 = jax.block_until_ready(
        ibasic_block_pallas(x, params, matmul_dtype=jnp.bfloat16))
    err_bf16 = float(jnp.max(jnp.abs(out_bf16 - ref)))
    assert jnp.allclose(out_bf16, ref, atol=1e-1, rtol=1e-1), err_bf16

    print("KERNEL_OK")
</pallas_src>

<mosaic_0001>
module attributes {stable_mosaic.version = 11 : i64} {
  func.func @iblock_kernel(%arg0: i32, %arg1: memref<1x16x256xf32, #tpu.memory_space<vmem>>, %arg2: memref<4x256xf32, #tpu.memory_space<vmem>>, %arg3: memref<5x64xf32, #tpu.memory_space<vmem>>, %arg4: memref<256x64xf32, #tpu.memory_space<vmem>>, %arg5: memref<3x64x64xf32, #tpu.memory_space<vmem>>, %arg6: memref<64x256xf32, #tpu.memory_space<vmem>>, %arg7: memref<1x16x256xf32, #tpu.memory_space<vmem>>) attributes {dimension_semantics = [#tpu.dimension_semantics<parallel>], iteration_bounds = array<i64: 2>, scalar_prefetch = 0 : i64, scratch_operands = 0 : i64, tpu.core_type = #tpu.core_type<tc>, window_params = [{transform_indices = @transform_0, window_bounds = array<i64: 1, 16, 256>}, {pipeline_mode = #tpu.pipeline_mode<synchronous>, transform_indices = @transform_1, window_bounds = array<i64: 4, 256>}, {pipeline_mode = #tpu.pipeline_mode<synchronous>, transform_indices = @transform_2, window_bounds = array<i64: 5, 64>}, {pipeline_mode = #tpu.pipeline_mode<synchronous>, transform_indices = @transform_3, window_bounds = array<i64: 256, 64>}, {pipeline_mode = #tpu.pipeline_mode<synchronous>, transform_indices = @transform_4, window_bounds = array<i64: 3, 64, 64>}, {pipeline_mode = #tpu.pipeline_mode<synchronous>, transform_indices = @transform_5, window_bounds = array<i64: 64, 256>}, {transform_indices = @transform_6, window_bounds = array<i64: 1, 16, 256>}]} {
    %c0 = arith.constant 0 : index
    %c0_0 = arith.constant 0 : index
    %c0_1 = arith.constant 0 : index
    %0 = vector.load %arg1[%c0, %c0_0, %c0_1] : memref<1x16x256xf32, #tpu.memory_space<vmem>>, vector<1x16x256xf32>
    %1 = vector.shape_cast %0 : vector<1x16x256xf32> to vector<16x256xf32>
    %c0_2 = arith.constant 0 : index
    %c0_3 = arith.constant 0 : index
    %2 = vector.load %arg2[%c0_2, %c0_3] : memref<4x256xf32, #tpu.memory_space<vmem>>, vector<1x256xf32>
    %3 = vector.shape_cast %2 : vector<1x256xf32> to vector<256xf32>
    %4 = vector.shape_cast %3 : vector<256xf32> to vector<1x256xf32>
    %5 = vector.broadcast %4 : vector<1x256xf32> to vector<16x256xf32>
    %6 = arith.mulf %1, %5 : vector<16x256xf32>
    %c1 = arith.constant 1 : index
    %c0_4 = arith.constant 0 : index
    %7 = vector.load %arg2[%c1, %c0_4] : memref<4x256xf32, #tpu.memory_space<vmem>>, vector<1x256xf32>
    %8 = vector.shape_cast %7 : vector<1x256xf32> to vector<256xf32>
    %9 = vector.shape_cast %8 : vector<256xf32> to vector<1x256xf32>
    %10 = vector.broadcast %9 : vector<1x256xf32> to vector<16x256xf32>
    %11 = arith.addf %6, %10 : vector<16x256xf32>
    %c0_5 = arith.constant 0 : index
    %c0_6 = arith.constant 0 : index
    %12 = vector.load %arg4[%c0_5, %c0_6] : memref<256x64xf32, #tpu.memory_space<vmem>>, vector<256x64xf32>
    %cst = arith.constant dense<0.000000e+00> : vector<16x64xf32>
    %13 = tpu.matmul %11, %12, %cst {dimension_numbers = #tpu.dot_dimension_numbers<[1], [0], [0], [1], [0, 0, 1, 1], [], []>} : vector<16x256xf32>, vector<256x64xf32>, vector<16x64xf32> -> vector<16x64xf32>
    %c0_7 = arith.constant 0 : index
    %c0_8 = arith.constant 0 : index
    %14 = vector.load %arg3[%c0_7, %c0_8] : memref<5x64xf32, #tpu.memory_space<vmem>>, vector<1x64xf32>
    %15 = vector.shape_cast %14 : vector<1x64xf32> to vector<64xf32>
    %16 = vector.shape_cast %15 : vector<64xf32> to vector<1x64xf32>
    %17 = vector.broadcast %16 : vector<1x64xf32> to vector<16x64xf32>
    %18 = arith.mulf %13, %17 : vector<16x64xf32>
    %c1_9 = arith.constant 1 : index
    %c0_10 = arith.constant 0 : index
    %19 = vector.load %arg3[%c1_9, %c0_10] : memref<5x64xf32, #tpu.memory_space<vmem>>, vector<1x64xf32>
    %20 = vector.shape_cast %19 : vector<1x64xf32> to vector<64xf32>
    %21 = vector.shape_cast %20 : vector<64xf32> to vector<1x64xf32>
    %22 = vector.broadcast %21 : vector<1x64xf32> to vector<16x64xf32>
    %23 = arith.addf %18, %22 : vector<16x64xf32>
    %24 = tpu.iota {dimensions = array<i32: 0>} : vector<16x64xi32>
    %c16_i32 = arith.constant 16 : i32
    %c0_i32 = arith.constant 0 : i32
    %25 = arith.cmpi eq, %c16_i32, %c0_i32 : i32
    %c1_i32 = arith.constant 1 : i32
    %26 = arith.select %25, %c1_i32, %c16_i32 : i32
    %27 = vector.broadcast %26 : i32 to vector<16x64xi32>
    %28 = arith.remsi %24, %27 : vector<16x64xi32>
    %c0_i32_11 = arith.constant 0 : i32
    %29 = vector.broadcast %c0_i32_11 : i32 to vector<16x64xi32>
    %30 = arith.cmpi ne, %28, %29 : vector<16x64xi32>
    %c0_i32_12 = arith.constant 0 : i32
    %31 = vector.broadcast %c0_i32_12 : i32 to vector<16x64xi32>
    %32 = arith.cmpi slt, %28, %31 : vector<16x64xi32>
    %c0_i32_13 = arith.constant 0 : i32
    %33 = arith.cmpi slt, %26, %c0_i32_13 : i32
    %34 = vector.broadcast %33 : i1 to vector<16x64xi1>
    %35 = vector.broadcast %34 : vector<16x64xi1> to vector<16x64xi1>
    %36 = arith.xori %32, %35 : vector<16x64xi1>
    %37 = arith.andi %36, %30 : vector<16x64xi1>
    %38 = vector.broadcast %26 : i32 to vector<16x64xi32>
    %39 = arith.addi %28, %38 : vector<16x64xi32>
    %40 = arith.select %37, %39, %28 : vector<16x64xi1>, vector<16x64xi32>
    %c0_i32_14 = arith.constant 0 : i32
    %41 = vector.broadcast %c0_i32_14 : i32 to vector<16x64xi32>
    %42 = arith.cmpi ne, %40, %41 : vector<16x64xi32>
    %c1_i32_15 = arith.constant 1 : i32
    %43 = tpu.dynamic_rotate %23 by %c1_i32_15 dim 0 : vector<16x64xf32>, i32 -> vector<16x64xf32>
    %cst_16 = arith.constant 0.000000e+00 : f32
    %44 = vector.broadcast %cst_16 : f32 to vector<16x64xf32>
    %45 = arith.select %42, %43, %44 : vector<16x64xi1>, vector<16x64xf32>
    %c15_i32 = arith.constant 15 : i32
    %46 = vector.broadcast %c15_i32 : i32 to vector<16x64xi32>
    %47 = arith.cmpi ne, %40, %46 : vector<16x64xi32>
    %c15_i32_17 = arith.constant 15 : i32
    %48 = tpu.dynamic_rotate %23 by %c15_i32_17 dim 0 : vector<16x64xf32>, i32 -> vector<16x64xf32>
    %cst_18 = arith.constant 0.000000e+00 : f32
    %49 = vector.broadcast %cst_18 : f32 to vector<16x64xf32>
    %50 = arith.select %47, %48, %49 : vector<16x64xi1>, vector<16x64xf32>
    %c0_19 = arith.constant 0 : index
    %c0_20 = arith.constant 0 : index
    %c0_21 = arith.constant 0 : index
    %51 = vector.load %arg5[%c0_19, %c0_20, %c0_21] : memref<3x64x64xf32, #tpu.memory_space<vmem>>, vector<1x64x64xf32>
    %52 = vector.shape_cast %51 : vector<1x64x64xf32> to vector<64x64xf32>
    %cst_22 = arith.constant dense<0.000000e+00> : vector<16x64xf32>
    %53 = tpu.matmul %45, %52, %cst_22 {dimension_numbers = #tpu.dot_dimension_numbers<[1], [0], [0], [1], [0, 0, 1, 1], [], []>} : vector<16x64xf32>, vector<64x64xf32>, vector<16x64xf32> -> vector<16x64xf32>
    %c1_23 = arith.constant 1 : index
    %c0_24 = arith.constant 0 : index
    %c0_25 = arith.constant 0 : index
    %54 = vector.load %arg5[%c1_23, %c0_24, %c0_25] : memref<3x64x64xf32, #tpu.memory_space<vmem>>, vector<1x64x64xf32>
    %55 = vector.shape_cast %54 : vector<1x64x64xf32> to vector<64x64xf32>
    %cst_26 = arith.constant dense<0.000000e+00> : vector<16x64xf32>
    %56 = tpu.matmul %23, %55, %cst_26 {dimension_numbers = #tpu.dot_dimension_numbers<[1], [0], [0], [1], [0, 0, 1, 1], [], []>} : vector<16x64xf32>, vector<64x64xf32>, vector<16x64xf32> -> vector<16x64xf32>
    %57 = arith.addf %53, %56 : vector<16x64xf32>
    %c2 = arith.constant 2 : index
    %c0_27 = arith.constant 0 : index
    %c0_28 = arith.constant 0 : index
    %58 = vector.load %arg5[%c2, %c0_27, %c0_28] : memref<3x64x64xf32, #tpu.memory_space<vmem>>, vector<1x64x64xf32>
    %59 = vector.shape_cast %58 : vector<1x64x64xf32> to vector<64x64xf32>
    %cst_29 = arith.constant dense<0.000000e+00> : vector<16x64xf32>
    %60 = tpu.matmul %50, %59, %cst_29 {dimension_numbers = #tpu.dot_dimension_numbers<[1], [0], [0], [1], [0, 0, 1, 1], [], []>} : vector<16x64xf32>, vector<64x64xf32>, vector<16x64xf32> -> vector<16x64xf32>
    %61 = arith.addf %57, %60 : vector<16x64xf32>
    %c2_30 = arith.constant 2 : index
    %c0_31 = arith.constant 0 : index
    %62 = vector.load %arg3[%c2_30, %c0_31] : memref<5x64xf32, #tpu.memory_space<vmem>>, vector<1x64xf32>
    %63 = vector.shape_cast %62 : vector<1x64xf32> to vector<64xf32>
    %64 = vector.shape_cast %63 : vector<64xf32> to vector<1x64xf32>
    %65 = vector.broadcast %64 : vector<1x64xf32> to vector<16x64xf32>
    %66 = arith.mulf %61, %65 : vector<16x64xf32>
    %c3 = arith.constant 3 : index
    %c0_32 = arith.constant 0 : index
    %67 = vector.load %arg3[%c3, %c0_32] : memref<5x64xf32, #tpu.memory_space<vmem>>, vector<1x64xf32>
    %68 = vector.shape_cast %67 : vector<1x64xf32> to vector<64xf32>
    %69 = vector.shape_cast %68 : vector<64xf32> to vector<1x64xf32>
    %70 = vector.broadcast %69 : vector<1x64xf32> to vector<16x64xf32>
    %71 = arith.addf %66, %70 : vector<16x64xf32>
    %cst_33 = arith.constant 0.000000e+00 : f32
    %72 = vector.broadcast %cst_33 : f32 to vector<16x64xf32>
    %73 = arith.cmpf ogt, %71, %72 : vector<16x64xf32>
    %c4 = arith.constant 4 : index
    %c0_34 = arith.constant 0 : index
    %74 = vector.load %arg3[%c4, %c0_34] : memref<5x64xf32, #tpu.memory_space<vmem>>, vector<1x64xf32>
    %75 = vector.shape_cast %74 : vector<1x64xf32> to vector<64xf32>
    %76 = vector.shape_cast %75 : vector<64xf32> to vector<1x64xf32>
    %77 = vector.broadcast %76 : vector<1x64xf32> to vector<16x64xf32>
    %78 = arith.mulf %77, %71 : vector<16x64xf32>
    %79 = arith.select %73, %71, %78 : vector<16x64xi1>, vector<16x64xf32>
    %c0_35 = arith.constant 0 : index
    %c0_36 = arith.constant 0 : index
    %80 = vector.load %arg6[%c0_35, %c0_36] : memref<64x256xf32, #tpu.memory_space<vmem>>, vector<64x256xf32>
    %cst_37 = arith.constant dense<0.000000e+00> : vector<16x256xf32>
    %81 = tpu.matmul %79, %80, %cst_37 {dimension_numbers = #tpu.dot_dimension_numbers<[1], [0], [0], [1], [0, 0, 1, 1], [], []>} : vector<16x64xf32>, vector<64x256xf32>, vector<16x256xf32> -> vector<16x256xf32>
    %c2_38 = arith.constant 2 : index
    %c0_39 = arith.constant 0 : index
    %82 = vector.load %arg2[%c2_38, %c0_39] : memref<4x256xf32, #tpu.memory_space<vmem>>, vector<1x256xf32>
    %83 = vector.shape_cast %82 : vector<1x256xf32> to vector<256xf32>
    %84 = vector.shape_cast %83 : vector<256xf32> to vector<1x256xf32>
    %85 = vector.broadcast %84 : vector<1x256xf32> to vector<16x256xf32>
    %86 = arith.mulf %81, %85 : vector<16x256xf32>
    %c3_40 = arith.constant 3 : index
    %c0_41 = arith.constant 0 : index
    %87 = vector.load %arg2[%c3_40, %c0_41] : memref<4x256xf32, #tpu.memory_space<vmem>>, vector<1x256xf32>
    %88 = vector.shape_cast %87 : vector<1x256xf32> to vector<256xf32>
    %89 = vector.shape_cast %88 : vector<256xf32> to vector<1x256xf32>
    %90 = vector.broadcast %89 : vector<1x256xf32> to vector<16x256xf32>
    %91 = arith.addf %86, %90 : vector<16x256xf32>
    %c0_42 = arith.constant 0 : index
    %c0_43 = arith.constant 0 : index
    %c0_44 = arith.constant 0 : index
    %92 = vector.load %arg1[%c0_42, %c0_43, %c0_44] : memref<1x16x256xf32, #tpu.memory_space<vmem>>, vector<1x16x256xf32>
    %93 = vector.shape_cast %92 : vector<1x16x256xf32> to vector<16x256xf32>
    %94 = arith.addf %91, %93 : vector<16x256xf32>
    %95 = vector.shape_cast %94 : vector<16x256xf32> to vector<1x16x256xf32>
    %c0_45 = arith.constant 0 : index
    %c0_46 = arith.constant 0 : index
    %c0_47 = arith.constant 0 : index
    %96 = vector.load %arg7[%c0_45, %c0_46, %c0_47] : memref<1x16x256xf32, #tpu.memory_space<vmem>>, vector<1x16x256xf32>
    tpu.vector_store %arg7[%c0_45, %c0_46, %c0_47], %95 {strides = array<i32>} : memref<1x16x256xf32, #tpu.memory_space<vmem>>, vector<1x16x256xf32>,
    return
  }
  func.func @transform_0(%arg0: i32) -> (i32, i32, i32) {
    %c0_i32 = arith.constant 0 : i32
    %c0_i32_0 = arith.constant 0 : i32
    %c0_i32_1 = arith.constant 0 : i32
    return %arg0, %c0_i32, %c0_i32_0 : i32, i32, i32
  }
  func.func @transform_1(%arg0: i32) -> (i32, i32) {
    %c0_i32 = arith.constant 0 : i32
    %c0_i32_0 = arith.constant 0 : i32
    %c0_i32_1 = arith.constant 0 : i32
    return %c0_i32, %c0_i32_0 : i32, i32
  }
  func.func @transform_2(%arg0: i32) -> (i32, i32) {
    %c0_i32 = arith.constant 0 : i32
    %c0_i32_0 = arith.constant 0 : i32
    %c0_i32_1 = arith.constant 0 : i32
    return %c0_i32, %c0_i32_0 : i32, i32
  }
  func.func @transform_3(%arg0: i32) -> (i32, i32) {
    %c0_i32 = arith.constant 0 : i32
    %c0_i32_0 = arith.constant 0 : i32
    %c0_i32_1 = arith.constant 0 : i32
    return %c0_i32, %c0_i32_0 : i32, i32
  }
  func.func @transform_4(%arg0: i32) -> (i32, i32, i32) {
    %c0_i32 = arith.constant 0 : i32
    %c0_i32_0 = arith.constant 0 : i32
    %c0_i32_1 = arith.constant 0 : i32
    %c0_i32_2 = arith.constant 0 : i32
    return %c0_i32, %c0_i32_0, %c0_i32_1 : i32, i32, i32
  }
  func.func @transform_5(%arg0: i32) -> (i32, i32) {
    %c0_i32 = arith.constant 0 : i32
    %c0_i32_0 = arith.constant 0 : i32
    %c0_i32_1 = arith.constant 0 : i32
    return %c0_i32, %c0_i32_0 : i32, i32
  }
  func.func @transform_6(%arg0: i32) -> (i32, i32, i32) {
    %c0_i32 = arith.constant 0 : i32
    %c0_i32_0 = arith.constant 0 : i32
    %c0_i32_1 = arith.constant 0 : i32
    return %arg0, %c0_i32, %c0_i32_0 : i32, i32, i32
  }
}

</mosaic_0001>

<bundles_post_ra>
// kernel: tpu_custom_call.1
= control target key start
LH: loop header
LB: loop body
LE: loop exit
PB: predicated region body
PF: predicated region fallthrough
CT: control target
= control target key end

     0   :  { %11 = vsyncpa [#allocation3], 0  ;;  %s1970_s0 = inlined_call_operand.vmem [shape: f32[2,16,256], index: 0, kind: input, shape index: {}]   ;;  %s1971_s1 = inlined_call_operand.hbm [shape: f32[4,256], index: 1, kind: input, shape index: {}]   ;;  %s1972_s2 = inlined_call_operand.hbm [shape: f32[5,64], index: 2, kind: input, shape index: {}]   ;;  %s1973_s3 = inlined_call_operand.vmem [shape: f32[256,64], index: 3, kind: input, shape index: {}]   ;;  %s1974_s4 = inlined_call_operand.vmem [shape: f32[3,64,64], index: 4, kind: input, shape index: {}]   ;;  %s1975_s5 = inlined_call_operand.vmem [shape: f32[64,256], index: 5, kind: input, shape index: {}]   ;;  %s1976_s6 = inlined_call_operand.hbm [shape: f32[2,16,256], index: 6, kind: output, shape index: {}]  }
   0x1   :  { %12 = vsyncpa [#allocation6], 0 }
   0x2   :  { %13 = vsyncpa [#allocation4], 0 }
   0x3   :  { %15 = vsyncpa [#allocation4 + $0x1], 0  ;;  %s1519_s21 = smov 0   ;;  %s1521_s22 = smov 0  }
   0x4   :  { %s1523_s23 = smov 0   ;;  %s1525_s24 = smov 0  }
   0x5 LB: > { %s1540_s25 = sadd.s32 4294967295, %s1476_s24   ;;  %s1015_s26 = sadd.s32 4294967294, %s1476_s24   ;;  %s1476_s24 = sphi %s1525_s24, %s1996_s24   ;;  %s1472_s23 = sphi %s1523_s23, %s1995_s23   ;;  %s1468_s22 = sphi %s1521_s22, %s1994_s22   ;;  %s1464_s21 = sphi %s1519_s21, %s1993_s21  }
   0x6   : > { %s1544_s27 = sadd.s32 1, %s1476_s24   ;;  %s159_s28 = sadd.s32 1, %s1472_s23 }
   0x7   : > { %s156_s29 = ssub.s32 %s1476_s24, %s1544_s27  ;;  %p169_p0 = scmp.ne.s32.totalorder %s1472_s23, %s1468_s22 }
   0x8   : > { %p157_p1 = scmp.eq.s32.totalorder %s156_s29, 0  ;;  %p170_p2 = scmp.eq.s32.totalorder %s1540_s25, 1 }
   0x9   : > { %p175_p3 = scmp.ne.s32.totalorder %s1468_s22, %s1464_s21  ;;  %p176_p4 = scmp.eq.s32.totalorder %s1015_s26, 1 }
   0xa   : > { %s1555_s30 = scalar_select %p157_p1, %s1472_s23, %s159_s28  }
   0xb   : > { %p1557_p5 = por %p170_p2, %p169_p0  ;;  %p1561_p6 = por %p176_p4, %p175_p3 }
   0xc   : > { %p1016_p7 = scmp.ge.s32.totalorder %s1476_s24, 1  ;;  %p183_p8 = scmp.lt.s32.totalorder %s1476_s24, 3 }
   0xd   : > { %s1980_s7 = scalar_select %p1557_p5, 1, 0 }
   0xe   : > { %s1981_s8 = scalar_select %p1561_p6, 1, 0 }
   0xf   : > { %p1977_p9 = scmp.eq.s32.totalorder %s1540_s25, 0  ;;  %p1568_p10 = pnand %p1016_p7, %p183_p8 }
  0x10   : > { %s1478_s10 = smov [#allocation2]   ;;  %s1479_s12 = smov [#allocation5]  }
  0x11   : > { %s1982_s9 = scalar_select %p1568_p10, 1, 0 }
  0x12   : > { %s196_s11 = sshll.u32 %s1478_s10, 4  ;;  %p1297_p11 = pneg %p1568_p10  ;;  %s197_s11 = int_to_ptr.vmem [resolvable:$true] %s196_s11 }
  0x13   : > { %s207_s13 = sshll.u32 %s1479_s12, 4  ;;  %s1350_s17 = scalar_lea.hbm %s1971_s1, 128  ;;  %s1580_s13 = int_to_ptr.vmem [resolvable:$true] %s207_s13 }
  0x14   : > { %p1576_p12 = pnand %p1977_p9, %p1297_p11  ;;  %p1351_p13 = scmp.ne.s32.totalorder %s1971_s1, %s1350_s17 }
  0x15   : > { %p1357_p3 = scmp.lt.u32.totalorder %s1350_s17, %s1971_s1 }
  0x16   : > { %p1352_p0 = pneg %p1576_p12 }
  0x18   : > { %p1353_p1 = pnand %p1352_p0, %p1351_p13 }
  0x1a   : > { %p1354_p2 = pneg %p1353_p1 }
  0x1c   : > { %p1359_p4 = pnand %p1357_p3, %p1354_p2 }
  0x1e   : > { %1362 = shalt.err (!%p1359_p4)
}
  0x1f   : > { %s1363_s28 = scalar_lea.vmem %s197_s11, 128  ;;  %p1371_p9 = scmp.lt.s32.totalorder %s197_s11, %s197_s11 }
  0x20   : > { %p1364_p7 = scmp.ne.s32.totalorder %s197_s11, %s1363_s28  ;;  %p1372_p6 = scmp.lt.s32.totalorder %s1363_s28, %s1363_s28 }
  0x22   : > { %p1366_p8 = pnand %p1364_p7, %p1352_p0  ;;  %p1373_p5 = por %p1372_p6, %p1371_p9 }
  0x24   : > { %p1367_p11 = pneg %p1366_p8 }
  0x26   : > { %p1374_p10 = pnand %p1373_p5, %p1367_p11 }
  0x28   : > { %1377 = shalt.err (!%p1374_p10)
}
  0x29   : > { %1300 = dma.hbm_to_vmem [thread:$0]  (!%p1576_p12), %s1971_s1, 128, %s197_s11, [#allocation3]  }
  0x2a   : > { %s1378_s16 = scalar_lea.hbm %s1972_s2, 128 }
  0x2b   : > { %p1379_p13 = scmp.ne.s32.totalorder %s1972_s2, %s1378_s16  ;;  %p1385_p9 = scmp.lt.u32.totalorder %s1378_s16, %s1972_s2 }
  0x2d   : > { %p1381_p6 = pnand %p1379_p13, %p1352_p0 }
  0x2f   : > { %p1382_p5 = pneg %p1381_p6 }
  0x31   : > { %p1387_p10 = pnand %p1385_p9, %p1382_p5 }
  0x33   : > { %1390 = shalt.err (!%p1387_p10)
}
  0x34   : > { %s1391_s11 = scalar_lea.vmem %s1580_s13, 128  ;;  %p1399_p4 = scmp.lt.s32.totalorder %s1580_s13, %s1580_s13 }
  0x35   : > { %p1392_p1 = scmp.ne.s32.totalorder %s1580_s13, %s1391_s11  ;;  %p1400_p7 = scmp.lt.s32.totalorder %s1391_s11, %s1391_s11 }
  0x37   : > { %p1394_p2 = pnand %p1392_p1, %p1352_p0  ;;  %p1401_p8 = por %p1400_p7, %p1399_p4 }
  0x39   : > { %p1395_p3 = pneg %p1394_p2 }
  0x3b   : > { %p1402_p11 = pnand %p1401_p8, %p1395_p3 }
  0x3d   : > { %1405 = shalt.err (!%p1402_p11)
}
  0x3e   : > { %1303 = dma.hbm_to_vmem [thread:$0]  (!%p1576_p12), %s1972_s2, 128, %s1580_s13, [#allocation6]  }
  0x3f   : > { %p1984_p13 = scmp.ne.s32.totalorder %s1982_s9, 0 }
  0x40   : > { %p1985_p6 = scmp.eq.s32.totalorder (!%p1984_p13), %s1540_s25, 0 }
  0x41   : > { %237 = sbr.rel (%p1984_p13) target bundleno = 825 (0x339), region = 44 }
  0x48   : > { %1451 = dma.done.wait (%p1985_p6), [#allocation3], 128   ;;  %p1986_p0 = pmov %p1985_p6 }
  0x4a   : > { %1453 = vsyncadd (%p1986_p0), [#allocation3], 4294967168  ;;  %p1987_p5 = pmov %p1986_p0 }
  0x4b   : > { %p1988_p9 = pmov %p1986_p0 }
  0x4c   : > { %1455 = dma.done.wait (%p1987_p5), [#allocation6], 128  }
  0x4d   : > { %1457 = vsyncadd (%p1988_p9), [#allocation6], 4294967168  ;;  %p271_p10 = scmp.lt.s32.totalorder %s1540_s25, 1  ;;  %v329_v0 = vld [vmem:[%s1973_s3 + $0x80] sm:$0xff]  ;;  %v330_v1 = vld [vmem:[%s1973_s3 + $0x88] sm:$0xff]  ;;  %v282_v3 = vlaneseq  ;;  %vm496_vm0 = vcmask 523264  }
  0x4e   : > { %v313_v2 = vld [vmem:[%s1973_s3] sm:$0xff]  ;;  %v1187_v4 = vpack.c.bf16 %v330_v1, %v329_v0  ;;  %v314_v5 = vld [vmem:[%s1973_s3 + $0x8] sm:$0xff]  ;;  %v331_v6 = vld [vmem:[%s1973_s3 + $0x90] sm:$0xff]  ;;  %s268_s13 = sand.u32 1, %s1468_s22   ;;  %s1061_s17 = sshll.u32 %s1540_s25, 9 }
  0x4f   : > { %s272_s15 = scalar_select %p271_p10, %s1540_s25, 1  ;;  %v332_v7 = vld [vmem:[%s1973_s3 + $0x98] sm:$0xff]  ;;  %v1189_v8 = vpack.c.bf16 %v314_v5, %v313_v2  ;;  %v315_v10 = vld [vmem:[%s1973_s3 + $0x10] sm:$0xff]  ;;  %v333_v12 = vld [vmem:[%s1973_s3 + $0xa0] sm:$0xff]  ;;  %v1671_v15 = vshrl.u32 %v282_v3, 7 }
  0x50   : > { %v1191_v9 = vpack.c.bf16 %v332_v7, %v331_v6  ;;  %v316_v11 = vld [vmem:[%s1973_s3 + $0x18] sm:$0xff]  ;;  %1188 = vmatprep.subr.bf16.mxu0 %v1187_v4  ;;  %v334_v13 = vld [vmem:[%s1973_s3 + $0xa8] sm:$0xff]  ;;  %v317_v17 = vld [vmem:[%s1973_s3 + $0x20] sm:$0xff]  ;;  %s1023_s29 = sshll.u32 %s268_s13, 5  ;;  %s1929_s25 = scalar_lea.sflag [#allocation4], %s268_s13 }
  0x51   : > { %1190 = vmatpush3.bf16.msra.mxu0 %v1189_v8  ;;  %v1193_v14 = vpack.c.bf16 %v316_v11, %v315_v10  ;;  %s1060_s16 = sshll.u32 %s272_s15, 5  ;;  %v1195_v16 = vpack.c.bf16 %v334_v13, %v333_v12  ;;  %v318_v18 = vld [vmem:[%s1973_s3 + $0x28] sm:$0xff]  ;;  %v335_v19 = vld [vmem:[%s1973_s3 + $0xb0] sm:$0xff]  ;;  %v336_v20 = vld [vmem:[%s1973_s3 + $0xb8] sm:$0xff]  ;;  %v1691_v22 = vsub.s32 1, %v1671_v15  ;;  %v1748_v53 = vsub.s32 0, %v1671_v15 }
  0x52   : > { %1192 = vmatprep.subr.bf16.mxu0 %v1191_v9  ;;  %s1688_s9 = scalar_lea.vmem %s1970_s0, %s1060_s16  ;;  %v1197_v21 = vpack.c.bf16 %v318_v18, %v317_v17  ;;  %v1199_v23 = vpack.c.bf16 %v336_v20, %v335_v19  ;;  %v319_v24 = vld [vmem:[%s1973_s3 + $0x30] sm:$0xff]  ;;  %v320_v25 = vld [vmem:[%s1973_s3 + $0x38] sm:$0xff]  ;;  %v337_v26 = vld [vmem:[%s1973_s3 + $0xc0] sm:$0xff]  ;;  %vm465_vm2 = vcmp.lt.s32.totalorder %v1671_v15, 1  ;;  %vm474_vm3 = vcmp.lt.s32.totalorder %v1671_v15, 7  ;;  %s270_s10 = scalar_lea.vmem [#allocation7], %s1023_s29 }
  0x53   : > { %v338_v27 = vld [vmem:[%s1973_s3 + $0xc8] sm:$0xff]  ;;  %v280_v29 = vld [vmem:[#allocation2] ss:$4 sm:$0x3]  ;;  %v1201_v31 = vpack.c.bf16 %v320_v25, %v319_v24  ;;  %v1030_v39 = vld [vmem:[%s1974_s4 + $0x50] sm:$0xff]  ;;  %s931_s12 = sshll.u32 %s270_s10, 4  ;;  %s1918_s12 = int_to_ptr.vmem [resolvable:$true] %s931_s12 }
  0x54   : > { %v1706_v28 = vld [vmem:[%s1688_s9 + $0x8] sm:$0xff]  ;;  %v297_v30 = vld [vmem:[#allocation2 + $0x1] ss:$4 sm:$0x3]  ;;  %v289_v34 = vrot.slane %v280_v29, %v1691_v22  ;;  %v1203_v36 = vpack.c.bf16 %v338_v27, %v337_v26  ;;  %v339_v40 = vld [vmem:[%s1973_s3 + $0xd0] sm:$0xff]  ;;  %v285_v60 = vrot.slane %v280_v29, %v1748_v53  ;;  %s1406_s16 = scalar_lea.vmem %s1918_s12, 512 }
  0x55   : > { %1194 = vmatpush3.bf16.msra.mxu0 %v1193_v14  ;;  %v321_v32 = vld [vmem:[%s1973_s3 + $0x40] sm:$0xff]  ;;  %v322_v33 = vld [vmem:[%s1973_s3 + $0x48] sm:$0xff]  ;;  %v306_v35 = vrot.slane %v297_v30, %v1691_v22  ;;  %v340_v41 = vld [vmem:[%s1973_s3 + $0xd8] sm:$0xff]  ;;  %v302_v3 = vrot.slane %v297_v30, %v1748_v53  ;;  %p1407_p12 = scmp.ne.s32.totalorder %s1918_s12, %s1406_s16  ;;  %p1991_p1 = scmp.ne.s32.totalorder %s1980_s7, 0 }
  0x56   : > { %1196 = vmatprep.subr.bf16.mxu0 %v1195_v16  ;;  %v1028_v37 = vld [vmem:[%s1974_s4 + $0x40] sm:$0xff]  ;;  %v1029_v38 = vld [vmem:[%s1974_s4 + $0x48] sm:$0xff]  ;;  %v293_v42 = vmul.f32 %v289_v34, %v1706_v28  ;;  %v1031_v43 = vld [vmem:[%s1974_s4 + $0x58] sm:$0xff]  ;;  %v1205_v46 = vpack.c.bf16 %v322_v33, %v321_v32  ;;  %v1207_v48 = vpack.c.bf16 %v340_v41, %v339_v40  ;;  %s1481_s20 = smov [#allocation7]  }
  0x57   : > { %v1219_v44 = vpack.c.bf16 %v1029_v38, %v1028_v37  ;;  %v1223_v45 = vpack.c.bf16 %v1031_v43, %v1030_v39  ;;  %v323_v49 = vld [vmem:[%s1973_s3 + $0x50] sm:$0xff]  ;;  %v324_v50 = vld [vmem:[%s1973_s3 + $0x58] sm:$0xff]  ;;  %v341_v51 = vld [vmem:[%s1973_s3 + $0xe0] sm:$0xff]  ;;  %p1408_p2 = pnand %p1407_p12, %p1991_p1  ;;  %s1410_s11 = sshll.u32 %s1481_s20, 4  ;;  %s1411_s11 = int_to_ptr.vmem [resolvable:$false] %s1410_s11 }
  0x58   : > { %v310_v47 = vadd.f32 %v306_v35, %v293_v42  ;;  %v342_v52 = vld [vmem:[%s1973_s3 + $0xe8] sm:$0xff]  ;;  %v1209_v54 = vpack.c.bf16 %v324_v50, %v323_v49  ;;  %v325_v56 = vld [vmem:[%s1973_s3 + $0x60] sm:$0xff]  ;;  %v343_v58 = vld [vmem:[%s1973_s3 + $0xf0] sm:$0xff]  ;;  %s1412_s26 = scalar_lea.vmem %s1411_s11, 1024  ;;  %p1413_p4 = scmp.lt.s32.totalorder %s1918_s12, %s1411_s11 }
  0x59   : > { %1198 = vmatpush3.bf16.msra.mxu0 %v1197_v21  ;;  %1220 = vmatprep.subr.bf16.mxu1 %v1219_v44  ;;  %v1211_v55 = vpack.c.bf16 %v342_v52, %v341_v51  ;;  %v326_v57 = vld [vmem:[%s1973_s3 + $0x68] sm:$0xff]  ;;  %v344_v59 = vld [vmem:[%s1973_s3 + $0xf8] sm:$0xff]  ;;  %v1764_v62 = vld [vmem:[%s1688_s9] sm:$0xff]  ;;  %p1409_p3 = pneg %p1408_p2  ;;  %p1414_p7 = scmp.lt.s32.totalorder %s1412_s26, %s1406_s16 }
  0x5a   : > { %1200 = vmatprep.subr.bf16.mxu0 %v1199_v23  ;;  %409 = vmatprep.mubr.f32.mxu0 %v310_v47  ;;  %v1213_v61 = vpack.c.bf16 %v326_v57, %v325_v56  ;;  %v1215_v63 = vpack.c.bf16 %v344_v59, %v343_v58  ;;  %v327_v0 = vld [vmem:[%s1973_s3 + $0x70] sm:$0xff]  ;;  %v328_v1 = vld [vmem:[%s1973_s3 + $0x78] sm:$0xff]  ;;  %v292_v4 = vmul.f32 %v285_v60, %v1764_v62  ;;  %v1032_v12 = vld [vmem:[%s1974_s4 + $0x60] sm:$0xff] }
  0x5b   : > { %1222 = vmatpush3.bf16.msra.mxu1 %v1219_v44  ;;  %v1773_v2 = vld [vmem:[%s1688_s9 + $0x18] sm:$0xff]  ;;  %v1217_v5 = vpack.c.bf16 %v328_v1, %v327_v0  ;;  %v1779_v7 = vld [vmem:[%s1688_s9 + $0x10] sm:$0xff]  ;;  %v1033_v13 = vld [vmem:[%s1974_s4 + $0x68] sm:$0xff]  ;;  %s1924_s9 = scalar_lea.hbm %s1976_s6, %s1061_s17  ;;  %p1415_p8 = por %p1414_p7, %p1413_p4 }
  0x5c   : > { %1224 = vmatprep.subr.bf16.mxu1 %v1223_v45  ;;  %v295_v6 = vmul.f32 %v289_v34, %v1773_v2  ;;  %v309_v8 = vadd.f32 %v302_v3, %v292_v4  ;;  %v294_v9 = vmul.f32 %v285_v60, %v1779_v7  ;;  %v1227_v14 = vpack.c.bf16 %v1033_v13, %v1032_v12  ;;  %v1034_v16 = vld [vmem:[%s1974_s4 + $0x70] sm:$0xff]  ;;  %v1035_v17 = vld [vmem:[%s1974_s4 + $0x78] sm:$0xff]  ;;  %v479_v19 = vld [vmem:[%s1974_s4] sm:$0xff] }
  0x5d   : > { %1202 = vmatpush3.bf16.msra.mxu0 %v1201_v31  ;;  %v1231_v18 = vpack.c.bf16 %v1035_v17, %v1034_v16  ;;  %v480_v20 = vld [vmem:[%s1974_s4 + $0x8] sm:$0xff]  ;;  %v779_v24 = vld [vmem:[%s1975_s5 + $0x18] sm:$0xff]  ;;  %v776_v25 = vld [vmem:[%s1975_s5] sm:$0xff]  ;;  %p1416_p11 = pnand %p1415_p8, %p1409_p3 }
  0x5e   : > { %1204 = vmatprep.subr.bf16.mxu0 %v1203_v36  ;;  %v312_v10 = vadd.f32 %v306_v35, %v295_v6  ;;  %v311_v11 = vadd.f32 %v302_v3, %v294_v9  ;;  %v1235_v21 = vpack.c.bf16 %v480_v20, %v479_v19  ;;  %v777_v23 = vld [vmem:[%s1975_s5 + $0x8] sm:$0xff]  ;;  %v778_v27 = vld [vmem:[%s1975_s5 + $0x10] sm:$0xff]  ;;  %v783_v30 = vld [vmem:[%s1975_s5 + $0x38] sm:$0xff]  ;;  %v436_v20 = vadd.s32 8, %v1671_v15 }
  0x5f   : > { %1226 = vmatpush3.bf16.msra.mxu1 %v1223_v45  ;;  %v1267_v26 = vpack.c.bf16 %v779_v24, %v777_v23  ;;  %v781_v29 = vld [vmem:[%s1975_s5 + $0x28] sm:$0xff]  ;;  %v1269_v31 = vpack.c.bf16 %v778_v27, %v776_v25  ;;  %v780_v33 = vld [vmem:[%s1975_s5 + $0x20] sm:$0xff]  ;;  %v782_v34 = vld [vmem:[%s1975_s5 + $0x30] sm:$0xff] }
  0x60   : > { %1228 = vmatprep.subr.bf16.mxu1 %v1227_v14  ;;  %v1271_v32 = vpack.c.bf16 %v783_v30, %v781_v29  ;;  %v1273_v35 = vpack.c.bf16 %v782_v34, %v780_v33  ;;  %v1026_v38 = vld [vmem:[#allocation5] ss:$0 sm:$0xff]  ;;  %v1027_v40 = vld [vmem:[#allocation5 + $0x1] ss:$0 sm:$0xff]  ;;  %v482_v47 = vld [vmem:[%s1974_s4 + $0x18] sm:$0xff]  ;;  %v448_v23 = vand.u32 15, %v436_v20 }
  0x61   : > { %1206 = vmatpush3.bf16.msra.mxu0 %v1205_v46  ;;  %v481_v46 = vld [vmem:[%s1974_s4 + $0x10] sm:$0xff]  ;;  %v483_v52 = vld [vmem:[%s1974_s4 + $0x20] sm:$0xff]  ;;  %v1041_v9 = vld [vmem:[%s1974_s4 + $0x88] sm:$0xff] }
  0x62   : > { %1208 = vmatprep.subr.bf16.mxu0 %v1207_v48  ;;  %v441_v48 = vand.u32 15, %v1671_v15  ;;  %v1239_v51 = vpack.c.bf16 %v482_v47, %v481_v46  ;;  %v485_v4 = vld [vmem:[%s1974_s4 + $0x30] sm:$0xff]  ;;  %v1043_v12 = vld [vmem:[%s1974_s4 + $0x98] sm:$0xff]  ;;  %v1045_v16 = vld [vmem:[%s1974_s4 + $0xa8] sm:$0xff]  ;;  %vm471_vm4 = vcmp.ne.s32.totalorder %v448_v23, 15 }
  0x63   : > { %1230 = vmatpush3.bf16.msra.mxu1 %v1227_v14  ;;  %v1044_v14 = vld [vmem:[%s1974_s4 + $0xa0] sm:$0xff]  ;;  %v1047_v19 = vld [vmem:[%s1974_s4 + $0xb8] sm:$0xff]  ;;  %v785_v25 = vld [vmem:[%s1975_s5 + $0x48] sm:$0xff] }
  0x64   : > { %1232 = vmatprep.subr.bf16.mxu1 %v1231_v18  ;;  %vm1838_vm1 = vcmp.ne.s32.totalorder %v441_v48, 0  ;;  %v1259_v17 = vpack.c.bf16 %v1045_v16, %v1044_v14  ;;  %v784_v27 = vld [vmem:[%s1975_s5 + $0x40] sm:$0xff]  ;;  %v786_v29 = vld [vmem:[%s1975_s5 + $0x50] sm:$0xff] }
  0x65   : > { %1210 = vmatpush3.bf16.msra.mxu0 %v1209_v54  ;;  %v484_v54 = vld [vmem:[%s1974_s4 + $0x28] sm:$0xff]  ;;  %v1277_v30 = vpack.c.bf16 %v786_v29, %v784_v27  ;;  %v788_v34 = vld [vmem:[%s1975_s5 + $0x60] sm:$0xff] }
  0x66   : > { %1212 = vmatprep.subr.bf16.mxu0 %v1211_v55  ;;  %v1243_v60 = vpack.c.bf16 %v484_v54, %v483_v52  ;;  %v893_v52 = vld [vmem:[#allocation2 + $0x3] ss:$4 sm:$0x3] }
  0x67   : > { %1234 = vmatpush3.bf16.msra.mxu1 %v1231_v18  ;;  %v1046_v18 = vld [vmem:[%s1974_s4 + $0xb0] sm:$0xff] }
  0x68   : > { %1236 = vmatprep.subr.bf16.mxu1 %v1235_v21 }
  0x69   : > { %1214 = vmatpush3.bf16.msra.mxu0 %v1213_v61 }
  0x6a   : > { %1216 = vmatprep.subr.bf16.mxu0 %v1215_v63 }
  0x6d   : > { %1218 = vmatpush3.bf16.msra.mxu0 %v1217_v5  ;;  %v486_v5 = vld [vmem:[%s1974_s4 + $0x38] sm:$0xff] }
  0x6e   : > { %1268 = vmatprep.subr.bf16.mxu0 %v1267_v26  ;;  %v1247_v6 = vpack.c.bf16 %v486_v5, %v485_v4  ;;  %v787_v26 = vld [vmem:[%s1975_s5 + $0x58] sm:$0xff] }
  0x6f   : > { %v1275_v15 = vpack.c.bf16 %v787_v26, %v785_v25 }
  0x70   : > { %410 = vmatmul.mubr.f32.vlgmr.msra.gmra.mrb[0].mxu0 %v309_v8  ;;  %v1040_v8 = vld [vmem:[%s1974_s4 + $0x80] sm:$0xff] }
  0x71   : > { %414 = vmatprep.mubr.f32.mxu0 %v312_v10  ;;  %1270 = vmatpush1.bf16.msra.mxu0 %v1269_v31  ;;  %v1251_v10 = vpack.c.bf16 %v1041_v9, %v1040_v8  ;;  %v789_v31 = vld [vmem:[%s1975_s5 + $0x68] sm:$0xff] }
  0x72   : > { %1272 = vmatprep.subr.bf16.mxu0 %v1271_v32  ;;  %v791_v32 = vld [vmem:[%s1975_s5 + $0x78] sm:$0xff] }
  0x73   : > { %v1279_v33 = vpack.c.bf16 %v791_v32, %v789_v31 }
  0x74   : > { %415 = vmatmul.mubr.f32.gmra.mrb[2].mxu0 %v311_v11  ;;  %v1042_v11 = vld [vmem:[%s1974_s4 + $0x90] sm:$0xff] }
  0x75   : > { %1274 = vmatpush1.bf16.msra.mxu0 %v1273_v35  ;;  %v1255_v13 = vpack.c.bf16 %v1043_v12, %v1042_v11  ;;  %v790_v35 = vld [vmem:[%s1975_s5 + $0x70] sm:$0xff] }
  0x76   : > { %1276 = vmatprep.subr.bf16.mxu0 %v1275_v15 }
  0x79   : > { %1278 = vmatpush1.bf16.msra.mxu0 %v1277_v30 }
  0x7a   : > { %1280 = vmatprep.subr.bf16.mxu0 %v1279_v33 }
 0x143   : > { %v1094_v36 = vpop.f32.mrb[0].mxu0 }
 0x144   : > { %v1095_v37 = vpop.f32.mrb[1].mxu0 }
 0x145   : > { %v1096_v39 = vadd.f32 %v1095_v37, %v1094_v36  ;;  %v1281_v36 = vpack.c.bf16 %v790_v35, %v788_v34  ;;  %v1480_v37 = vmov 0.0  }
 0x146   : > { %862 = vmatprep.mubr.f32.mxu0 %v1480_v37 }
 0x147   : > { %v425_v41 = vmul.f32 %v1096_v39, %v1026_v38  ;;  %v1097_v42 = vpop.f32.mrb[2].mxu0  ;;  %1282 = vmatpush1.bf16.msra.mxu0 %v1281_v36 }
 0x148   : > { %v1098_v43 = vpop.f32.mrb[3].mxu0 }
 0x149   : > { %v1099_v44 = vadd.f32 %v1098_v43, %v1097_v42  ;;  %v432_v45 = vadd.f32 %v1027_v40, %v425_v41  ;;  %v1051_v41 = vld [vmem:[#allocation5 + $0x3] ss:$0 sm:$0xff] }
 0x14b   : > { %v426_v49 = vmul.f32 %v1099_v44, %v1026_v38  ;;  %1146 = vmatprep.mubr.msk.f32.mxu1 %vm496_vm0, %v432_v45  ;;  %v463_v56 = vrot.slane %v432_v45, 7  ;;  %v472_v58 = vrot.slane %v432_v45, 1  ;;  %v1050_v38 = vld [vmem:[#allocation5 + $0x2] ss:$0 sm:$0xff]  ;;  %v1052_v44 = vld [vmem:[#allocation5 + $0x4] ss:$0 sm:$0xff] }
 0x14d   : > { %v433_v50 = vadd.f32 %v1027_v40, %v426_v49 }
 0x14f   : > { %1147 = vmatmul.mubr.msk.f32.vlgmr.msra.gmra.mrb[0].mxu1 %vm496_vm0, %v433_v50  ;;  %v464_v57 = vrot.slane %v433_v50, 7  ;;  %v473_v59 = vrot.slane %v433_v50, 1 }
 0x150   : > { %1238 = vmatpush3.bf16.msra.mxu1 %v1235_v21  ;;  %v1263_v21 = vpack.c.bf16 %v1047_v19, %v1046_v18 }
 0x151   : > { %1240 = vmatprep.subr.bf16.mxu1 %v1239_v51  ;;  %v467_v61 = vsel %vm465_vm2, %v464_v57, %v463_v56  ;;  %v466_v63 = vsel %vm465_vm2, %v463_v56, %v464_v57  ;;  %v475_v0 = vsel %vm474_vm3, %v472_v58, %v473_v59  ;;  %v476_v1 = vsel %vm474_vm3, %v473_v59, %v472_v58 }
 0x152   : > { %v468_v3 = vsel %vm1838_vm1, %v467_v61, 0.0  ;;  %v478_v24 = vsel %vm471_vm4, %v476_v1, 0.0  ;;  %v898_v56 = vrot.slane %v893_v52, %v1748_v53  ;;  %v902_v58 = vrot.slane %v893_v52, %v1691_v22 }
 0x153   : > { %1165 = vmatprep.mubr.msk.f32.mxu1 %vm496_vm0, %v468_v3 }
 0x154   : > { %1242 = vmatpush3.bf16.msra.mxu1 %v1239_v51  ;;  %v876_v51 = vld [vmem:[#allocation2 + $0x2] ss:$4 sm:$0x3] }
 0x155   : > { %1244 = vmatprep.subr.bf16.mxu1 %v1243_v60  ;;  %v881_v54 = vrot.slane %v876_v51, %v1748_v53  ;;  %v885_v55 = vrot.slane %v876_v51, %v1691_v22 }
 0x158   : > { %1246 = vmatpush3.bf16.msra.mxu1 %v1243_v60 }
 0x159   : > { %1248 = vmatprep.subr.bf16.mxu1 %v1247_v6 }
 0x15c   : > { %1250 = vmatpush3.bf16.msra.mxu1 %v1247_v6 }
 0x15d   : > { %1252 = vmatprep.subr.bf16.mxu1 %v1251_v10 }
 0x15f   : > { %1166 = vmatmul.mubr.msk.f32.vlgmr.msra.gmra.mrb[0].mxu1 %vm496_vm0, %v466_v63 }
 0x160   : > { %1254 = vmatpush3.bf16.msra.mxu1 %v1251_v10  ;;  %1184 = vmatprep.mubr.msk.f32.mxu1 %vm496_vm0, %v475_v0 }
 0x161   : > { %1256 = vmatprep.subr.bf16.mxu1 %v1255_v13 }
 0x164   : > { %1258 = vmatpush3.bf16.msra.mxu1 %v1255_v13 }
 0x165   : > { %1260 = vmatprep.subr.bf16.mxu1 %v1259_v17 }
 0x168   : > { %1262 = vmatpush3.bf16.msra.mxu1 %v1259_v17 }
 0x169   : > { %1264 = vmatprep.subr.bf16.mxu1 %v1263_v21 }
 0x16c   : > { %1266 = vmatpush3.bf16.msra.mxu1 %v1263_v21 }
 0x16f   : > { %1185 = vmatmul.mubr.msk.f32.vlgmr.msra.gmra.mrb[0].mxu1 %vm496_vm0, %v478_v24 }
 0x242   : > { %v1186_v39 = vpop.f32.mrb[0].mxu1 }
 0x243   : > { %v757_v40 = vmul.f32 %v1186_v39, %v1050_v38  ;;  %v740_v42 = vpop.f32.mrb[1].mxu1 }
 0x244   : > { %v756_v43 = vmul.f32 %v1050_v38, %v740_v42 }
 0x245   : > { %v764_v45 = vadd.f32 %v1051_v41, %v757_v40 }
 0x246   : > { %v763_v46 = vadd.f32 %v1051_v41, %v756_v43 }
 0x247   : > { %v773_v48 = vmul.f32 %v1052_v44, %v764_v45  ;;  %vm766_vm6 = vcmp.gt.f32.partialorder %v764_v45, 0.0 }
 0x248   : > { %vm765_vm5 = vcmp.gt.f32.partialorder %v763_v46, 0.0  ;;  %v772_v47 = vmul.f32 %v1052_v44, %v763_v46 }
 0x249   : > { %v775_v50 = vsel %vm766_vm6, %v764_v45, %v773_v48 }
 0x24a   : > { %v774_v49 = vsel %vm765_vm5, %v763_v46, %v772_v47 }
 0x24b   : > { %1053 = vmatmul.mubr.msk.f32.vlgmr.msra.gmra.mrb[4].mxu0 %vm496_vm0, %v774_v49 }
 0x24c   : > { %868 = vmatprep.mubr.f32.mxu0 %v1480_v37 }
 0x24f   : > { %1054 = vmatmul.mubr.msk.f32.gmra.mrb[6].mxu0 %vm496_vm0, %v775_v50 }
 0x31e   : > { %v864_v57 = vpop.f32.mrb[4].mxu0 }
 0x31f   : > { %v888_v59 = vmul.f32 %v881_v54, %v864_v57  ;;  %v866_v60 = vpop.f32.mrb[5].mxu0 }
 0x320   : > { %v889_v61 = vmul.f32 %v885_v55, %v866_v60 }
 0x321   : > { %v905_v63 = vadd.f32 %v898_v56, %v888_v59 }
 0x322   : > { %v906_v0 = vadd.f32 %v902_v58, %v889_v61  ;;  %v870_v1 = vpop.f32.mrb[6].mxu0 }
 0x323   : > { %v909_v3 = vadd.f32 %v905_v63, %v1764_v62  ;;  %v890_v4 = vmul.f32 %v881_v54, %v870_v1  ;;  %v872_v5 = vpop.f32.mrb[7].mxu0 }
 0x324   : > { %v910_v53 = vadd.f32 %v906_v0, %v1706_v28  ;;  %v891_v6 = vmul.f32 %v885_v55, %v872_v5 }
 0x325   : > { %913 = vst [vmem:[%s270_s10] sm:$0xff] %v909_v3  ;;  %v907_v22 = vadd.f32 %v898_v56, %v890_v4 }
 0x326   : > { %914 = vst [vmem:[%s270_s10 + $0x8] sm:$0xff] %v910_v53  ;;  %v908_v8 = vadd.f32 %v902_v58, %v891_v6 }
 0x327   : > { %v911_v62 = vadd.f32 %v907_v22, %v1779_v7 }
 0x328   : > { %v912_v28 = vadd.f32 %v908_v8, %v1773_v2 }
 0x329   : > { %915 = vst [vmem:[%s270_s10 + $0x10] sm:$0xff] %v911_v62 }
 0x32a   : > { %916 = vst [vmem:[%s270_s10 + $0x18] sm:$0xff] %v912_v28 }
 0x32b   : > { %1419 = shalt.err (!%p1416_p11)
}
 0x32c   : > { %s1420_s28 = scalar_lea.hbm %s1924_s9, 512  ;;  %s1424_s13 = scalar_lea.hbm %s1976_s6, 1024 }
 0x32d   : > { %p1421_p13 = scmp.ne.s32.totalorder %s1924_s9, %s1420_s28  ;;  %p1425_p5 = scmp.lt.u32.totalorder %s1924_s9, %s1976_s6 }
 0x32e   : > { %p1426_p9 = scmp.lt.u32.totalorder %s1424_s13, %s1420_s28  ;;  %p1428_p12 = scmp.lt.u32.totalorder %s1420_s28, %s1924_s9 }
 0x32f   : > { %p1422_p6 = pnand %p1421_p13, %p1991_p1 }
 0x330   : > { %p1427_p10 = por %p1426_p9, %p1425_p5 }
 0x331   : > { %p1423_p0 = pneg %p1422_p6 }
 0x332   : > { %p1429_p2 = por %p1428_p12, %p1427_p10 }
 0x334   : > { %p1430_p3 = pnand %p1429_p2, %p1423_p0 }
 0x336   : > { %1433 = shalt.err (!%p1430_p3)
}
 0x337   : > { %s1482_s17 = smov 256   ;;  %s1483_s18 = smov 16  }
 0x338   : > { %1295 = dma.vmem_to_hbm [thread:$0]  (%p1991_p1), %s1918_s12, 512, %s1924_s9, %s1929_s25, %s1482_s17, %s1482_s17, %s1483_s18  }
 0x339 PF: > { %p1312_p4 = scmp.ge.s32.totalorder %s1476_s24, 2  ;;  %s946_s19 = sand.u32 1, %s1464_s21  }
 0x33a   : > { %p1992_p7 = scmp.ne.s32.totalorder %s1981_s8, 0  ;;  %s947_s16 = scalar_lea.sflag [#allocation4], %s946_s19 }
 0x33c   : > { %p1305_p8 = pnand %p1312_p4, %p1992_p7 }
 0x33e   : > { %1459 = dma.done.wait (!%p1305_p8), %s947_s16, 512  }
 0x33f   : > { %1461 = vsyncadd (!%p1305_p8), %s947_s16, 4294966784  ;;  %p18_p11 = scmp.ge.s32.totalorder %s1544_s27, 4   ;;  %s1993_s21 = smov %s1468_s22 }
 0x340   : > { %s1994_s22 = smov %s1472_s23  ;;  %s1995_s23 = smov %s1555_s30 }
 0x341   : > { %s1996_s24 = smov %s1544_s27  ;;  %20 = sbr.rel (!%p18_p11) target bundleno = 5 (0x5), region = 93 }
 0x348   :  { %952 = vsyncpa [#allocation3], 1 }
 0x349   :  { %954 = vsyncpa [#allocation3 + $0x1], 1 }
 0x34a   :  { %955 = vsyncpa [#allocation6], 1 }
 0x34b   :  { %956 = vsyncpa [#allocation4], 1 }
 0x34c   :  { %958 = vsyncpa [#allocation4 + $0x1], 1 }

</bundles_post_ra>
